<compile_context>
chip_gen: v5e
topology: v5e:2x2
jax: 0.10.0
libtpu: 0.0.40
codegen_flags: <defaults>
</compile_context>

<pallas_src>
import functools

import jax
import jax.numpy as jnp
from jax.experimental import pallas as pl
from jax.experimental.pallas import tpu as pltpu

LANE = 128
SUBLANE = 8


def _round_up(v, m):
    return ((v + m - 1) // m) * m


def weekday_lstm_kernel(x_ref, w_gate_ref, affine_ref, w_fc_ref, b_fc_ref,
                        out_ref, *, hidden_size):
    # x_ref:      (TB, 8)    rows of input features, col 7 == 1.0 (bias hook)
    # w_gate_ref: (8, GW)    densely packed [W_i*0.5 | W_g | W_o*0.5 | 0-pad],
    #                        row 7 = folded (b_ih + b_hh) biases (same scaling)
    # affine_ref: (2, GW)    per-lane (a, b): 0.5/0.5 on i,o lanes, 1/0 on g lanes,
    #                        0/0 on pad lanes
    # w_fc_ref:   (H, 128)   fc weight, zero-padded to a lane-dense slab
    # b_fc_ref:   (1, 128)   fc bias, zero-padded
    # out_ref:    (TB, 128)  lane-dense output slab (cols 7.. are padding)
    H = hidden_size
    x = x_ref[...]                                        # (TB, 8)

    # One MXU op: bias folded in via the constant-1.0 column of x.
    gates = jnp.dot(x, w_gate_ref[...],
                    preferred_element_type=jnp.float32)   # (TB, GW) f32

    # Single tanh pass over the whole slab; the per-lane affine turns the i/o
    # lanes back into sigmoids (sigmoid(z) = 0.5*tanh(z/2) + 0.5; the 0.5 input
    # scale was folded into w_gate on the host).  Pad lanes have a = b = 0.
    t = jnp.tanh(gates)
    act = affine_ref[0:1, :] * t + affine_ref[1:2, :]     # (TB, GW) f32

    i_g = act[:, 0 * H:1 * H]                             # sigmoid(z_i)
    g_g = act[:, 1 * H:2 * H]                             # tanh(z_g)
    o_g = act[:, 2 * H:3 * H]                             # sigmoid(z_o)

    # Zero initial (h, c) => gates depend only on x and c_new = i * g.
    c_new = i_g * g_g
    h_act = jnp.tanh(o_g * jnp.tanh(c_new))               # F.tanh(h_new), (TB, H)

    out = jnp.dot(h_act.astype(w_fc_ref.dtype), w_fc_ref[...],
                  preferred_element_type=jnp.float32) + b_fc_ref[...]
    out_ref[...] = out.astype(out_ref.dtype)


def prepare_params(params, mxu_dtype=jnp.float32):
    """One-time host-side weight packing (layout plumbing, no per-call cost)."""
    H = params["w_hh"].shape[1]
    GW = _round_up(3 * H, LANE)          # dense gate slab width
    OUTP = LANE                          # 7 output features -> one full vreg

    w_ih = params["w_ih"].astype(jnp.float32)                      # (4H, 7) [i,f,g,o]
    b_all = (params["b_ih"] + params["b_hh"]).astype(jnp.float32)  # (4H,)

    w_gate = jnp.zeros((8, GW), jnp.float32)
    a_vec = jnp.zeros((1, GW), jnp.float32)
    b_vec = jnp.zeros((1, GW), jnp.float32)
    # Only the live gates (forget gate is dead with zero initial cell state).
    # (gate index in PyTorch order, input scale, affine a, affine b)
    for k, (gate_idx, scale, aa, bb) in enumerate((
            (0, 0.5, 0.5, 0.5),      # i: sigmoid via tanh
            (2, 1.0, 1.0, 0.0),      # g: plain tanh
            (3, 0.5, 0.5, 0.5))):    # o: sigmoid via tanh
        lo = k * H
        w_blk = w_ih[gate_idx * H:(gate_idx + 1) * H, :].T * scale   # (7, H)
        b_blk = b_all[gate_idx * H:(gate_idx + 1) * H] * scale       # (H,)
        w_gate = w_gate.at[:7, lo:lo + H].set(w_blk)
        w_gate = w_gate.at[7, lo:lo + H].set(b_blk)
        a_vec = a_vec.at[0, lo:lo + H].set(aa)
        b_vec = b_vec.at[0, lo:lo + H].set(bb)
    affine = jnp.concatenate([a_vec, b_vec], axis=0)                 # (2, GW)

    w_fc = (jnp.zeros((H, OUTP), jnp.float32)
            .at[:, :7].set(params["w_fc"].astype(jnp.float32).T))
    b_fc = (jnp.zeros((1, OUTP), jnp.float32)
            .at[0, :7].set(params["b_fc"].astype(jnp.float32)))

    return {
        "w_gate": w_gate.astype(mxu_dtype),   # MXU operands may be bf16 (v6e/v7x)
        "affine": affine,                     # VPU math stays f32 (v5e-safe)
        "w_fc": w_fc.astype(mxu_dtype),
        "b_fc": b_fc,
    }


def _forward_impl(x, packed):
    B = x.shape[0]
    H = packed["w_fc"].shape[0]
    GW = packed["w_gate"].shape[1]
    OUTP = packed["w_fc"].shape[1]
    mxu_dtype = packed["w_gate"].dtype

    # Fixed batch tile (<=256, multiple of 8); pad batch up to a multiple of TB.
    TB = min(256, _round_up(B, SUBLANE))
    Bp = _round_up(B, TB)
    grid = (Bp // TB,)

    # Augment x with a constant-1.0 bias column, pad batch rows with zeros.
    x_aug = jnp.concatenate(
        [x.astype(jnp.float32), jnp.ones((B, 1), jnp.float32)], axis=1)
    if Bp != B:
        x_aug = jnp.pad(x_aug, ((0, Bp - B), (0, 0)))
    x_aug = x_aug.astype(mxu_dtype)

    kernel = functools.partial(weekday_lstm_kernel, hidden_size=H)

    out = pl.pallas_call(
        kernel,
        out_shape=jax.ShapeDtypeStruct((Bp, OUTP), jnp.float32),
        grid=grid,
        in_specs=[
            pl.BlockSpec((TB, 8), lambda i: (i, 0)),
            pl.BlockSpec((8, GW), lambda i: (0, 0)),
            pl.BlockSpec((2, GW), lambda i: (0, 0)),
            pl.BlockSpec((H, OUTP), lambda i: (0, 0)),
            pl.BlockSpec((1, OUTP), lambda i: (0, 0)),
        ],
        out_specs=pl.BlockSpec((TB, OUTP), lambda i: (i, 0)),
        compiler_params=pltpu.CompilerParams(
            dimension_semantics=("parallel",)),
    )(x_aug, packed["w_gate"], packed["affine"], packed["w_fc"], packed["b_fc"])

    return out[:B, :7]


weekday_lstm_forward = jax.jit(_forward_impl)


# ---------------------------------------------------------------------------
# Deterministic params + pure-JAX reference (full, un-simplified LSTMCell math)
# ---------------------------------------------------------------------------
def make_params(key, hidden_size):
    # Mimics PyTorch's U(-1/sqrt(H), 1/sqrt(H)) init.
    k = 1.0 / jnp.sqrt(jnp.float32(hidden_size))
    keys = jax.random.split(key, 6)
    u = lambda kk, shape: jax.random.uniform(kk, shape, jnp.float32, -k, k)
    return {
        "w_ih": u(keys[0], (4 * hidden_size, 7)),
        "w_hh": u(keys[1], (4 * hidden_size, hidden_size)),
        "b_ih": u(keys[2], (4 * hidden_size,)),
        "b_hh": u(keys[3], (4 * hidden_size,)),
        "w_fc": u(keys[4], (7, hidden_size)),
        "b_fc": u(keys[5], (7,)),
    }


def reference_forward(x, params):
    B = x.shape[0]
    H = params["w_hh"].shape[1]
    h = jnp.zeros((B, H), jnp.float32)
    c = jnp.zeros((B, H), jnp.float32)
    gates = (x @ params["w_ih"].T + params["b_ih"]
             + h @ params["w_hh"].T + params["b_hh"])
    i_g, f_g, g_g, o_g = jnp.split(gates, 4, axis=1)
    i_g = jax.nn.sigmoid(i_g)
    f_g = jax.nn.sigmoid(f_g)
    g_g = jnp.tanh(g_g)
    o_g = jax.nn.sigmoid(o_g)
    c_new = f_g * c + i_g * g_g
    h_new = o_g * jnp.tanh(c_new)
    return jnp.tanh(h_new) @ params["w_fc"].T + params["b_fc"]


if __name__ == "__main__":
    key = jax.random.PRNGKey(0)
    k_x, k_p, k_x2 = jax.random.split(key, 3)

    batch, hidden_size = 2, 32
    x = jax.random.normal(k_x, (batch, 7), jnp.float32)
    params = make_params(k_p, hidden_size)
    packed = prepare_params(params)          # one-time weight packing

    out = jax.block_until_ready(weekday_lstm_forward(x, packed))
    ref = reference_forward(x, params)
    assert out.shape == (batch, 7)
    assert jnp.allclose(out, ref, atol=1e-5, rtol=1e-5)

    # Exercise the tiled path (grid > 1, padded batch) for robustness.
    x_big = jax.random.normal(k_x2, (300, 7), jnp.float32)
    out_big = jax.block_until_ready(weekday_lstm_forward(x_big, packed))
    ref_big = reference_forward(x_big, params)
    assert out_big.shape == (300, 7)
    assert jnp.allclose(out_big, ref_big, atol=1e-4, rtol=1e-4)

    print("KERNEL_OK")
</pallas_src>

<mosaic_0001>
module attributes {stable_mosaic.version = 11 : i64} {
  func.func @weekday_lstm_kernel(%arg0: i32, %arg1: memref<8x8xf32, #tpu.memory_space<vmem>>, %arg2: memref<8x128xf32, #tpu.memory_space<vmem>>, %arg3: memref<2x128xf32, #tpu.memory_space<vmem>>, %arg4: memref<32x128xf32, #tpu.memory_space<vmem>>, %arg5: memref<1x128xf32, #tpu.memory_space<vmem>>, %arg6: memref<8x128xf32, #tpu.memory_space<vmem>>) attributes {dimension_semantics = [#tpu.dimension_semantics<parallel>], iteration_bounds = array<i64: 1>, scalar_prefetch = 0 : i64, scratch_operands = 0 : i64, tpu.core_type = #tpu.core_type<tc>, window_params = [{transform_indices = @transform_0, window_bounds = array<i64: 8, 8>}, {pipeline_mode = #tpu.pipeline_mode<synchronous>, transform_indices = @transform_1, window_bounds = array<i64: 8, 128>}, {pipeline_mode = #tpu.pipeline_mode<synchronous>, transform_indices = @transform_2, window_bounds = array<i64: 2, 128>}, {pipeline_mode = #tpu.pipeline_mode<synchronous>, transform_indices = @transform_3, window_bounds = array<i64: 32, 128>}, {pipeline_mode = #tpu.pipeline_mode<synchronous>, transform_indices = @transform_4, window_bounds = array<i64: 1, 128>}, {transform_indices = @transform_5, window_bounds = array<i64: 8, 128>}]} {
    %c0 = arith.constant 0 : index
    %c0_0 = arith.constant 0 : index
    %0 = vector.load %arg1[%c0, %c0_0] : memref<8x8xf32, #tpu.memory_space<vmem>>, vector<8x8xf32>
    %c0_1 = arith.constant 0 : index
    %c0_2 = arith.constant 0 : index
    %1 = vector.load %arg2[%c0_1, %c0_2] : memref<8x128xf32, #tpu.memory_space<vmem>>, vector<8x128xf32>
    %cst = arith.constant dense<0.000000e+00> : vector<8x128xf32>
    %2 = tpu.matmul %0, %1, %cst {dimension_numbers = #tpu.dot_dimension_numbers<[1], [0], [0], [1], [0, 0, 1, 1], [], []>} : vector<8x8xf32>, vector<8x128xf32>, vector<8x128xf32> -> vector<8x128xf32>
    %3 = math.tanh %2 : vector<8x128xf32>
    %c0_3 = arith.constant 0 : index
    %c0_4 = arith.constant 0 : index
    %4 = vector.load %arg3[%c0_3, %c0_4] : memref<2x128xf32, #tpu.memory_space<vmem>>, vector<1x128xf32>
    %5 = vector.broadcast %4 : vector<1x128xf32> to vector<8x128xf32>
    %6 = arith.mulf %5, %3 : vector<8x128xf32>
    %c1 = arith.constant 1 : index
    %c0_5 = arith.constant 0 : index
    %7 = vector.load %arg3[%c1, %c0_5] : memref<2x128xf32, #tpu.memory_space<vmem>>, vector<1x128xf32>
    %8 = vector.broadcast %7 : vector<1x128xf32> to vector<8x128xf32>
    %9 = arith.addf %6, %8 : vector<8x128xf32>
    %10 = vector.extract_strided_slice %9 {offsets = [0, 0], sizes = [8, 32], strides = [1, 1]} : vector<8x128xf32> to vector<8x32xf32>
    %11 = vector.extract_strided_slice %9 {offsets = [0, 32], sizes = [8, 32], strides = [1, 1]} : vector<8x128xf32> to vector<8x32xf32>
    %12 = vector.extract_strided_slice %9 {offsets = [0, 64], sizes = [8, 32], strides = [1, 1]} : vector<8x128xf32> to vector<8x32xf32>
    %13 = arith.mulf %10, %11 : vector<8x32xf32>
    %14 = math.tanh %13 : vector<8x32xf32>
    %15 = arith.mulf %12, %14 : vector<8x32xf32>
    %16 = math.tanh %15 : vector<8x32xf32>
    %c0_6 = arith.constant 0 : index
    %c0_7 = arith.constant 0 : index
    %17 = vector.load %arg4[%c0_6, %c0_7] : memref<32x128xf32, #tpu.memory_space<vmem>>, vector<32x128xf32>
    %cst_8 = arith.constant dense<0.000000e+00> : vector<8x128xf32>
    %18 = tpu.matmul %16, %17, %cst_8 {dimension_numbers = #tpu.dot_dimension_numbers<[1], [0], [0], [1], [0, 0, 1, 1], [], []>} : vector<8x32xf32>, vector<32x128xf32>, vector<8x128xf32> -> vector<8x128xf32>
    %c0_9 = arith.constant 0 : index
    %c0_10 = arith.constant 0 : index
    %19 = vector.load %arg5[%c0_9, %c0_10] : memref<1x128xf32, #tpu.memory_space<vmem>>, vector<1x128xf32>
    %20 = vector.broadcast %19 : vector<1x128xf32> to vector<8x128xf32>
    %21 = arith.addf %18, %20 : vector<8x128xf32>
    %c0_11 = arith.constant 0 : index
    %c0_12 = arith.constant 0 : index
    %22 = vector.load %arg6[%c0_11, %c0_12] : memref<8x128xf32, #tpu.memory_space<vmem>>, vector<8x128xf32>
    tpu.vector_store %arg6[%c0_11, %c0_12], %21 {strides = array<i32>} : memref<8x128xf32, #tpu.memory_space<vmem>>, vector<8x128xf32>,
    return
  }
  func.func @transform_0(%arg0: i32) -> (i32, i32) {
    %c0_i32 = arith.constant 0 : i32
    %c0_i32_0 = arith.constant 0 : i32
    return %arg0, %c0_i32 : i32, i32
  }
  func.func @transform_1(%arg0: i32) -> (i32, i32) {
    %c0_i32 = arith.constant 0 : i32
    %c0_i32_0 = arith.constant 0 : i32
    %c0_i32_1 = arith.constant 0 : i32
    return %c0_i32, %c0_i32_0 : i32, i32
  }
  func.func @transform_2(%arg0: i32) -> (i32, i32) {
    %c0_i32 = arith.constant 0 : i32
    %c0_i32_0 = arith.constant 0 : i32
    %c0_i32_1 = arith.constant 0 : i32
    return %c0_i32, %c0_i32_0 : i32, i32
  }
  func.func @transform_3(%arg0: i32) -> (i32, i32) {
    %c0_i32 = arith.constant 0 : i32
    %c0_i32_0 = arith.constant 0 : i32
    %c0_i32_1 = arith.constant 0 : i32
    return %c0_i32, %c0_i32_0 : i32, i32
  }
  func.func @transform_4(%arg0: i32) -> (i32, i32) {
    %c0_i32 = arith.constant 0 : i32
    %c0_i32_0 = arith.constant 0 : i32
    %c0_i32_1 = arith.constant 0 : i32
    return %c0_i32, %c0_i32_0 : i32, i32
  }
  func.func @transform_5(%arg0: i32) -> (i32, i32) {
    %c0_i32 = arith.constant 0 : i32
    %c0_i32_0 = arith.constant 0 : i32
    return %arg0, %c0_i32 : i32, i32
  }
}

</mosaic_0001>

<bundles_post_ra>
// kernel: _forward_impl.1
= control target key start
LH: loop header
LB: loop body
LE: loop exit
PB: predicated region body
PF: predicated region fallthrough
CT: control target
= control target key end

     0   :  { %10 = vsyncpa [#allocation3], 0  ;;  %s163_s21 = smov [#allocation2]   ;;  %s164_s23 = smov 128   ;;  %s219_s0 = inlined_call_operand.vmem [shape: f32[8,8], index: 0, kind: input, shape index: {}]   ;;  %s220_s1 = inlined_call_operand.vmem [shape: f32[8,128], index: 1, kind: input, shape index: {}]   ;;  %s221_s2 = inlined_call_operand.vmem [shape: f32[2,128], index: 2, kind: input, shape index: {}]   ;;  %s222_s3 = inlined_call_operand.hbm [shape: f32[32,128], index: 3, kind: input, shape index: {}]   ;;  %s223_s4 = inlined_call_operand.vmem [shape: f32[1,128], index: 4, kind: input, shape index: {}]   ;;  %s224_s5 = inlined_call_operand.vmem [shape: f32[8,128], index: 5, kind: output, shape index: {}]  }
   0x1   :  { %s21_s20 = sshll.u32 %s222_s3, 4  ;;  %s23_s22 = sshll.u32 %s163_s21, 4  ;;  %s22_s20 = int_to_ptr.hbm [resolvable:$true] %s21_s20  ;;  %s24_s22 = int_to_ptr.vmem [resolvable:$true] %s23_s22 }
   0x2   :  { %s165_s24 = smov 8  }
   0x3   :  { %29 = dma.hbm_to_vmem [thread:$0]  %s22_s20, 512, %s24_s22, [#allocation3], %s164_s23, %s164_s23, %s165_s24  }
   0x4   :  { %161 = dma.done.wait [#allocation3], 512  }
   0x5   :  { %162 = vsyncadd [#allocation3], 4294966784  ;;  %vm38_vm0 = vcmask 64512   ;;  %v37_v0 = vld [vmem:[%s220_s1] sm:$0xff]  ;;  %s166_s1 = smov 96   ;;  %v84_v11 = vld [vmem:[#allocation2 + $0x18] sm:$0xff] }
   0x6   :  { %v36_v1 = vld [vmem:[%s219_s0] sm:$0xff]  ;;  %57 = vmatpush.msra.mxu0 %v37_v0  ;;  %s167_s0 = smov 64   ;;  %v83_v12 = vld [vmem:[#allocation2 + $0x10] sm:$0xff]  ;;  %107 = vmatpush.msra.mxu1 %v84_v11  ;;  %v82_v13 = vld [vmem:[#allocation2 + $0x8] sm:$0xff]  ;;  %vm92_vm1 = vcmask 261120  }
   0x7   :  { %121 = vmatmul.msk.f32.vlgmr.msra.gmra.mxu0 %vm38_vm0, %v36_v1  ;;  %v128_v3 = vld [vmem:[%s221_s2] ss:$0 sm:$0xff]  ;;  %v129_v4 = vld [vmem:[%s221_s2 + $0x1] ss:$0 sm:$0xff] }
   0x8   :  { %108 = vmatpush.msra.mxu1 %v83_v12  ;;  %v81_v14 = vld [vmem:[#allocation2] sm:$0xff] }
   0x9   :  { %v130_v19 = vld [vmem:[%s223_s4] ss:$0 sm:$0xff] }
   0xa   :  { %109 = vmatpush.msra.mxu1 %v82_v13 }
   0xc   :  { %110 = vmatpush.msra.mxu1 %v81_v14 }
  0x84   :  { %v59_v2 = vpop.f32.mrf.mxu0 }
  0x85   :  { %131 = vtanh.f32 %v59_v2 }
  0x8b   :  { %v132_v5 = vpop.eup %131 }
  0x8c   :  { %v65_v6 = vmul.f32 %v132_v5, %v128_v3 }
  0x8e   :  { %v68_v7 = vadd.f32 %v129_v4, %v65_v6 }
  0x90   :  { %70 = vrot.lane.b32.xlu0 %v68_v7, %s166_s1 }
 0x102   :  { %v71_v8 = vpop.permute.xlu0 %70 }
 0x103   :  { %v73_v9 = vmul.f32 %v71_v8, %v68_v7 }
 0x105   :  { %133 = vtanh.f32 %v73_v9 }
 0x10b   :  { %v134_v10 = vpop.eup %133 }
 0x10c   :  { %76 = vrot.lane.b32.xlu0 %v134_v10, %s167_s0 }
 0x17e   :  { %v77_v15 = vpop.permute.xlu0 %76 }
 0x17f   :  { %v79_v16 = vmul.f32 %v77_v15, %v68_v7 }
 0x181   :  { %135 = vtanh.f32 %v79_v16 }
 0x187   :  { %v136_v17 = vpop.eup %135 }
 0x188   :  { %90 = vrot.lane.b32.xlu1 %v136_v17, %s167_s0 }
 0x1fa   :  { %v91_v18 = vpop.permute.xlu1 %90 }
 0x1fb   :  { %122 = vmatmul.msk.f32.vlgmr.msra.gmra.mxu1 %vm92_vm1, %v91_v18 }
 0x278   :  { %v112_v20 = vpop.f32.mrf.mxu1 }
 0x279   :  { %v113_v21 = vadd.f32 %v130_v19, %v112_v20 }
 0x27b   :  { %115 = vst [vmem:[%s224_s5] sm:$0xff] %v113_v21 }
 0x27c   :  { %120 = vsyncpa [#allocation3], 1 }

</bundles_post_ra>
